<compile_context>
chip_gen: v7x
topology: tpu7x:2x2x1
jax: 0.10.0
libtpu: 0.0.40
codegen_flags: <defaults>
</compile_context>

<pallas_src>
import functools

import jax
import jax.numpy as jnp
from jax import lax
from jax.experimental import pallas as pl
from jax.experimental.pallas import tpu as pltpu


# ----------------------------------------------------------------------------
# Tiling helpers (VMEM-budget aware so the same code fits v5e/v6e (128 MiB) and
# v7x (64 MiB) without retuning).
# ----------------------------------------------------------------------------
def _row_tile(n, budget_bytes=16 << 20):
    """Row tile for the [tm, N] f32 distance output block (double-buffered)."""
    if n % 128 != 0:
        return n                       # full-dim block is always layout-legal
    best = 128
    t = 256
    while t <= n:
        if n % t == 0 and 2 * t * n * 4 <= budget_bytes:
            best = t
        t += 128
    return best


def _pick_k_tile(k, n_pts, c_diff, budget_bytes=8 << 20):
    """Largest divisor of k whose bf16 diff tile (double-buffered) fits the
    budget while keeping the lane dim (kt*N) 128-aligned (or full)."""
    best = 1 if n_pts % 128 == 0 else k
    for kt in range(1, k + 1):
        if k % kt:
            continue
        if kt != k and (kt * n_pts) % 128 != 0:
            continue
        if 2 * c_diff * kt * n_pts * 2 <= budget_bytes:
            best = kt
    return best


def _pick_cout_tile(cout, n_pts, budget_bytes=8 << 20, cap=256):
    """Output-channel tile (multiple of 8) bounding scratch+output VMEM.  The
    Cout grid axis is 'parallel', so tiling also helps v7x megacore at small B."""
    cands = [ct for ct in range(8, cout + 1, 8)
             if cout % ct == 0 and ct <= cap and 12 * ct * n_pts <= budget_bytes]
    return max(cands) if cands else cout


# ----------------------------------------------------------------------------
# Kernel 1: pairwise squared distance (square_distance), augmented single matmul
# ----------------------------------------------------------------------------
def _pairwise_dist_kernel(lhs_ref, rhs_ref, o_ref):
    # lhs_ref: [1, 5, TM]  rows = [-2*p (3), ones (1), |p|^2 (1)]  (query tile)
    # rhs_ref: [1, 5, N]   rows = [ p (3), |p|^2 (1), ones (1) ]   (all points)
    # o_ref:   [1, TM, N]
    g = lax.dot_general(lhs_ref[0], rhs_ref[0], (((0,), (0,)), ((), ())),
                        preferred_element_type=jnp.float32)       # [TM, N]
    o_ref[0] = jnp.maximum(g, 1e-12)                              # torch.clamp(min=1e-12)


def pairwise_sqdist(coords):
    """coords: [B, 3, N] f32 -> dist [B, N, N] f32 (rows = query points)."""
    B, _, N = coords.shape
    coords = coords.astype(jnp.float32)
    sq = jnp.sum(coords * coords, axis=1, keepdims=True)          # [B, 1, N]
    ones = jnp.ones_like(sq)
    lhs = jnp.concatenate([-2.0 * coords, ones, sq], axis=1)      # [B, 5, N]
    rhs = jnp.concatenate([coords, sq, ones], axis=1)             # [B, 5, N]
    tm = _row_tile(N)
    est = 2 * tm * N * 4 + 2 * 5 * tm * 4 + 2 * 5 * N * 4
    vmem_limit = int(max(est + (8 << 20), 32 << 20))
    return pl.pallas_call(
        _pairwise_dist_kernel,
        out_shape=jax.ShapeDtypeStruct((B, N, N), jnp.float32),
        grid=(B, N // tm),
        in_specs=[
            pl.BlockSpec((1, 5, tm), lambda b, r: (b, 0, r)),
            pl.BlockSpec((1, 5, N), lambda b, r: (b, 0, 0)),
        ],
        out_specs=pl.BlockSpec((1, tm, N), lambda b, r: (b, r, 0)),
        compiler_params=pltpu.CompilerParams(
            dimension_semantics=("parallel", "parallel"),
            vmem_limit_bytes=vmem_limit),
    )(lhs, rhs)


# ----------------------------------------------------------------------------
# Kernel 2: fused 1x1 Conv2d + InstanceNorm2d(affine=False) + LeakyReLU(0.2)
#           + max over the k neighbors, tiled over (Cout, k*N).
# ----------------------------------------------------------------------------
def _edge_agg_kernel(ctr_ref, diff_ref, wc_ref, wd_ref, o_ref,
                     max_sc, sum_sc, ssq_sc, *, k_tile, n_pts, k_total):
    # ctr_ref:  [1, Cc, N]      center features (bf16) -- used only at finalize
    # diff_ref: [1, Cd, kt*N]   neighbor-minus-center tile (bf16), col = j*N + n
    # wc_ref:   [CT, Cc]        weight slice acting on the center half
    # wd_ref:   [CT, Cd]        weight slice acting on the difference half
    # o_ref:    [1, CT, N]
    # max_sc:   [CT, N] f32     running max over neighbors of yd = wd @ diff
    # sum_sc:   [CT, N] f32     per-lane sum over neighbors of yd
    # ssq_sc:   [CT, 1] f32     sum over neighbors & lanes of yd^2
    t = pl.program_id(2)

    yd = lax.dot_general(wd_ref[...], diff_ref[0], (((1,), (0,)), ((), ())),
                         preferred_element_type=jnp.float32)      # [CT, kt*N]

    # Combine the tile's neighbor chunks in vregs; each scratch slab is written
    # exactly once per grid step (single vst pass per slab).
    chunks = [yd[:, j * n_pts:(j + 1) * n_pts] for j in range(k_tile)]
    m_tile = chunks[0]
    s_tile = chunks[0]
    for c in chunks[1:]:
        m_tile = jnp.maximum(m_tile, c)
        s_tile = s_tile + c
    ssq_tile = jnp.sum(yd * yd, axis=1, keepdims=True)            # [CT, 1]

    @pl.when(t == 0)
    def _init():
        max_sc[...] = m_tile
        sum_sc[...] = s_tile
        ssq_sc[...] = ssq_tile

    @pl.when(t > 0)
    def _acc():
        max_sc[...] = jnp.maximum(max_sc[...], m_tile)
        sum_sc[...] = sum_sc[...] + s_tile
        ssq_sc[...] = ssq_sc[...] + ssq_tile

    @pl.when(t == pl.num_programs(2) - 1)
    def _finalize():
        # Center-half contribution: identical for every neighbor j, so it is
        # computed exactly ONCE here and folded into max/stats analytically.
        yc = lax.dot_general(wc_ref[...], ctr_ref[0], (((1,), (0,)), ((), ())),
                             preferred_element_type=jnp.float32)  # [CT, N]
        k_f = float(k_total)
        inv_cnt = 1.0 / (k_f * float(n_pts))
        s_lane = sum_sc[...]                                      # [CT, N]
        total_sum = (jnp.sum(s_lane, axis=1, keepdims=True)
                     + k_f * jnp.sum(yc, axis=1, keepdims=True))  # [CT, 1]
        total_ssq = (ssq_sc[...]
                     + 2.0 * jnp.sum(yc * s_lane, axis=1, keepdims=True)
                     + k_f * jnp.sum(yc * yc, axis=1, keepdims=True))
        mean = total_sum * inv_cnt
        var = jnp.maximum(total_ssq * inv_cnt - mean * mean, 0.0)  # clamp cancellation
        scale = lax.rsqrt(var + 1e-5)
        # max_j y_j = yc + max_j yd_j ; normalize + LeakyReLU(0.2) are monotonic,
        # so only the maxed [CT, N] slab needs the epilogue.
        z = (max_sc[...] + yc - mean) * scale
        o_ref[0] = jnp.where(z >= 0.0, z, 0.2 * z).astype(o_ref.dtype)


def edge_agg_block(ctr, diff, wc, wd, *, k, k_tile=None, cout_tile=None):
    """ctr: [B, Cc, N], diff: [B, Cd, k*N] (col = j*N+n), wc: [Cout, Cc],
    wd: [Cout, Cd]  ->  [B, Cout, N] in ctr.dtype (stats kept in f32)."""
    B, Cc, N = ctr.shape
    Cd = diff.shape[1]
    assert diff.shape[2] == k * N
    Cout = wc.shape[0]
    if k_tile is None:
        k_tile = _pick_k_tile(k, N, Cd)
    assert k % k_tile == 0
    steps = k // k_tile
    if cout_tile is None:
        cout_tile = _pick_cout_tile(Cout, N)
    assert Cout % cout_tile == 0
    n_ct = Cout // cout_tile

    est = (2 * Cd * k_tile * N * 2          # diff tile (bf16, double-buffered)
           + 2 * Cc * N * 2                 # center features (bf16)
           + 2 * cout_tile * N * 2          # resident output block
           + 2 * cout_tile * N * 4          # max/sum f32 scratch slabs
           + cout_tile * 128 * 4            # ssq scratch (lane padded)
           + 2 * cout_tile * (Cc + Cd) * 2)
    vmem_limit = int(max(est + (8 << 20), 32 << 20))

    kern = functools.partial(_edge_agg_kernel, k_tile=k_tile, n_pts=N, k_total=k)
    return pl.pallas_call(
        kern,
        out_shape=jax.ShapeDtypeStruct((B, Cout, N), ctr.dtype),
        grid=(B, n_ct, steps),
        in_specs=[
            pl.BlockSpec((1, Cc, N), lambda b, c, t: (b, 0, 0)),
            pl.BlockSpec((1, Cd, k_tile * N), lambda b, c, t: (b, 0, t)),
            pl.BlockSpec((cout_tile, Cc), lambda b, c, t: (c, 0)),
            pl.BlockSpec((cout_tile, Cd), lambda b, c, t: (c, 0)),
        ],
        out_specs=pl.BlockSpec((1, cout_tile, N), lambda b, c, t: (b, c, 0)),
        scratch_shapes=[
            pltpu.VMEM((cout_tile, N), jnp.float32),   # running max of yd
            pltpu.VMEM((cout_tile, N), jnp.float32),   # per-lane sum of yd
            pltpu.VMEM((cout_tile, 1), jnp.float32),   # sum of yd^2 (per channel)
        ],
        compiler_params=pltpu.CompilerParams(
            dimension_semantics=("parallel", "parallel", "arbitrary"),
            vmem_limit_bytes=vmem_limit),
    )(ctr, diff, wc, wd)


# ----------------------------------------------------------------------------
# Kernel 3: layer-3 1x1 Conv2d + InstanceNorm + LeakyReLU with the (x0,x1,x2)
#           concat fused away (w3 column-split in-kernel).
# ----------------------------------------------------------------------------
def _conv3_kernel(x0_ref, x1_ref, x2_ref, wa_ref, wb_ref, wc_ref, o_ref, *, inv_n):
    y = lax.dot_general(wa_ref[...], x0_ref[0], (((1,), (0,)), ((), ())),
                        preferred_element_type=jnp.float32)
    y = y + lax.dot_general(wb_ref[...], x1_ref[0], (((1,), (0,)), ((), ())),
                            preferred_element_type=jnp.float32)
    y = y + lax.dot_general(wc_ref[...], x2_ref[0], (((1,), (0,)), ((), ())),
                            preferred_element_type=jnp.float32)   # [CT, N]
    mean = jnp.sum(y, axis=1, keepdims=True) * inv_n
    var = jnp.maximum(jnp.sum(y * y, axis=1, keepdims=True) * inv_n - mean * mean, 0.0)
    z = (y - mean) * lax.rsqrt(var + 1e-5)
    o_ref[0] = jnp.where(z >= 0.0, z, 0.2 * z).astype(o_ref.dtype)


def conv3_block(x0, x1, x2, w3a, w3b, w3c, *, cout_tile=None):
    """x0:[B,C0,N], x1:[B,C1,N], x2:[B,C2,N]; w3*: [Cout, C*] -> [B, Cout, N] f32."""
    B, C0, N = x0.shape
    C1, C2 = x1.shape[1], x2.shape[1]
    Cout = w3a.shape[0]
    if cout_tile is None:
        cout_tile = _pick_cout_tile(Cout, N)
    assert Cout % cout_tile == 0
    n_ct = Cout // cout_tile

    est = (2 * (C0 + C1 + C2) * N * 2 + 2 * cout_tile * N * 4
           + 2 * cout_tile * (C0 + C1 + C2) * 2)
    vmem_limit = int(max(est + (8 << 20), 32 << 20))

    kern = functools.partial(_conv3_kernel, inv_n=1.0 / float(N))
    return pl.pallas_call(
        kern,
        out_shape=jax.ShapeDtypeStruct((B, Cout, N), jnp.float32),
        grid=(B, n_ct),
        in_specs=[
            pl.BlockSpec((1, C0, N), lambda b, c: (b, 0, 0)),
            pl.BlockSpec((1, C1, N), lambda b, c: (b, 0, 0)),
            pl.BlockSpec((1, C2, N), lambda b, c: (b, 0, 0)),
            pl.BlockSpec((cout_tile, C0), lambda b, c: (c, 0)),
            pl.BlockSpec((cout_tile, C1), lambda b, c: (c, 0)),
            pl.BlockSpec((cout_tile, C2), lambda b, c: (c, 0)),
        ],
        out_specs=pl.BlockSpec((1, cout_tile, N), lambda b, c: (b, c, 0)),
        compiler_params=pltpu.CompilerParams(
            dimension_semantics=("parallel", "parallel"),
            vmem_limit_bytes=vmem_limit),
    )(x0, x1, x2, w3a, w3b, w3c)


# ----------------------------------------------------------------------------
# Glue: KNN selection + neighbor gather (data-dependent -> plain JAX)
# ----------------------------------------------------------------------------
def knn_indices(coords, k):
    """coords: [B, 3, N] -> neighbor indices [B, N, k] (self excluded)."""
    dist = pairwise_sqdist(coords)                                # Pallas kernel
    # TODO(synk): top-k selection (and a streaming k-smallest that avoids the
    # [B,N,N] HBM round-trip) plus the gather in neighbor_diff are data-dependent;
    # fusing them into the edge kernel needs in-kernel gather / scalar prefetch,
    # so they stay in plain JAX.
    _, idx = lax.top_k(-dist, k + 1)                              # ascending dist
    return idx[:, :, 1:]                                          # drop self


def neighbor_diff(feats, idx):
    """feats: [B, C, N], idx: [B, N, k] -> (nbr - ctr) as [B, C, k*N], col=j*N+n."""
    B, C, N = feats.shape
    k = idx.shape[-1]
    nbr = jax.vmap(lambda f, i: f[:, i])(feats, idx)              # [B, C, N, k]
    diff = nbr - feats[:, :, :, None]
    return jnp.transpose(diff, (0, 1, 3, 2)).reshape(B, C, k * N)


def self_attention_forward(coords, feats, params, k=10,
                           compute_dtype=jnp.bfloat16):
    """coords: [B, 3, N], feats: [B, C, N] -> [B, C, N] (f32)."""
    B, C, N = feats.shape
    w1, w2, w3 = params                        # PyTorch layout: [Cout, Cin]

    def split_edge_w(w):
        cin = w.shape[1] // 2
        return (w[:, :cin].astype(compute_dtype),
                w[:, cin:].astype(compute_dtype))

    w1c, w1d = split_edge_w(w1)
    w2c, w2d = split_edge_w(w2)
    # Layer-3 weight column split replaces the HBM concat of (x0, x1, x2).
    w3a = w3[:, :C].astype(compute_dtype)
    w3b = w3[:, C:2 * C].astype(compute_dtype)
    w3c = w3[:, 2 * C:].astype(compute_dtype)

    # coords never change -> compute the KNN index table once for both layers.
    idx = knn_indices(coords, k)

    x0f = feats.astype(jnp.float32)
    x0 = x0f.astype(compute_dtype)                                 # [B, C, N]
    d1 = neighbor_diff(x0f, idx).astype(compute_dtype)             # diff in f32, then bf16
    x1 = edge_agg_block(x0, d1, w1c, w1d, k=k)                     # [B, C, N] bf16
    d2 = neighbor_diff(x1.astype(jnp.float32), idx).astype(compute_dtype)
    x2 = edge_agg_block(x1, d2, w2c, w2d, k=k)                     # [B, 2C, N] bf16
    return conv3_block(x0, x1, x2, w3a, w3b, w3c)                  # [B, C, N] f32


# ----------------------------------------------------------------------------
# Pure-JAX f32 reference (mirrors the PyTorch forward)
# ----------------------------------------------------------------------------
def reference_forward(coords, feats, params, idx):
    w1, w2, w3 = params

    def graph_feat(f):
        nbr = jax.vmap(lambda ff, ii: ff[:, ii])(f, idx)          # [B, C, N, k]
        ctr = jnp.broadcast_to(f[..., None], nbr.shape)
        return jnp.concatenate([ctr, nbr - ctr], axis=1)          # [B, 2C, N, k]

    def conv_in_lrelu(x, w):
        y = jnp.einsum('bcnk,dc->bdnk', x, w, precision='highest')
        mean = jnp.mean(y, axis=(2, 3), keepdims=True)
        var = jnp.var(y, axis=(2, 3), keepdims=True)
        y = (y - mean) / jnp.sqrt(var + 1e-5)
        return jnp.where(y >= 0, y, 0.2 * y)

    x0 = feats[..., None]
    x1 = jnp.max(conv_in_lrelu(graph_feat(feats), w1), axis=-1, keepdims=True)
    x2 = jnp.max(conv_in_lrelu(graph_feat(x1[..., 0]), w2), axis=-1, keepdims=True)
    x3 = conv_in_lrelu(jnp.concatenate([x0, x1, x2], axis=1), w3)
    return x3[..., 0]


if __name__ == "__main__":
    B, C, N, K = 2, 4, 128, 8        # feature_dim = 4, 128 points, k = 8

    key = jax.random.PRNGKey(0)
    kc, kf, k1, k2, k3 = jax.random.split(key, 5)
    coords = jax.random.normal(kc, (B, 3, N), dtype=jnp.float32)
    feats = jax.random.normal(kf, (B, C, N), dtype=jnp.float32)

    # Conv2d 1x1 weights (bias=False), PyTorch layout [Cout, Cin].
    w1 = 0.1 * jax.random.normal(k1, (C, 2 * C), dtype=jnp.float32)
    w2 = 0.1 * jax.random.normal(k2, (2 * C, 2 * C), dtype=jnp.float32)
    w3 = 0.1 * jax.random.normal(k3, (C, 4 * C), dtype=jnp.float32)
    params = (w1, w2, w3)

    out = jax.block_until_ready(self_attention_forward(coords, feats, params, k=K))
    assert out.shape == (B, C, N), out.shape

    # Check the pairwise-distance kernel against pure JAX.
    pts = jnp.transpose(coords, (0, 2, 1))
    d_ref = jnp.maximum(
        jnp.sum((pts[:, :, None, :] - pts[:, None, :, :]) ** 2, axis=-1), 1e-12)
    d_pal = jax.block_until_ready(pairwise_sqdist(coords))
    assert jnp.allclose(d_pal, d_ref, atol=1e-3, rtol=1e-3), "distance mismatch"

    # End-to-end check (shared neighbor indices so fp round-off can't flip a
    # top-k tie; tolerance covers the bf16 MXU inputs / bf16 activations in
    # the Pallas path -- all statistics stay in f32).
    idx = knn_indices(coords, K)
    ref = jax.block_until_ready(reference_forward(coords, feats, params, idx))
    err = float(jnp.max(jnp.abs(out - ref)))
    assert jnp.allclose(out, ref, atol=5e-2, rtol=5e-2), f"mismatch, max err {err}"
    print("KERNEL_OK")
</pallas_src>

<mosaic_0001>
module attributes {stable_mosaic.version = 11 : i64} {
  func.func @_pairwise_dist_kernel(%arg0: i32, %arg1: i32, %arg2: memref<1x5x128xf32, #tpu.memory_space<vmem>>, %arg3: memref<1x5x128xf32, #tpu.memory_space<vmem>>, %arg4: memref<1x128x128xf32, #tpu.memory_space<vmem>>) attributes {dimension_semantics = [#tpu.dimension_semantics<parallel>, #tpu.dimension_semantics<parallel>], iteration_bounds = array<i64: 2, 1>, scalar_prefetch = 0 : i64, scratch_operands = 0 : i64, tpu.core_type = #tpu.core_type<tc>, window_params = [{transform_indices = @transform_0, window_bounds = array<i64: 1, 5, 128>}, {transform_indices = @transform_1, window_bounds = array<i64: 1, 5, 128>}, {transform_indices = @transform_2, window_bounds = array<i64: 1, 128, 128>}]} {
    %c0 = arith.constant 0 : index
    %c0_0 = arith.constant 0 : index
    %c0_1 = arith.constant 0 : index
    %0 = vector.load %arg2[%c0, %c0_0, %c0_1] : memref<1x5x128xf32, #tpu.memory_space<vmem>>, vector<1x5x128xf32>
    %1 = vector.shape_cast %0 : vector<1x5x128xf32> to vector<5x128xf32>
    %c0_2 = arith.constant 0 : index
    %c0_3 = arith.constant 0 : index
    %c0_4 = arith.constant 0 : index
    %2 = vector.load %arg3[%c0_2, %c0_3, %c0_4] : memref<1x5x128xf32, #tpu.memory_space<vmem>>, vector<1x5x128xf32>
    %3 = vector.shape_cast %2 : vector<1x5x128xf32> to vector<5x128xf32>
    %cst = arith.constant dense<0.000000e+00> : vector<128x128xf32>
    %4 = tpu.matmul %1, %3, %cst {dimension_numbers = #tpu.dot_dimension_numbers<[0], [0], [1], [1], [0, 1, 1, 1], [], []>} : vector<5x128xf32>, vector<5x128xf32>, vector<128x128xf32> -> vector<128x128xf32>
    %cst_5 = arith.constant 9.99999996E-13 : f32
    %5 = vector.broadcast %cst_5 : f32 to vector<128x128xf32>
    %6 = arith.maximumf %4, %5 : vector<128x128xf32>
    %c0_6 = arith.constant 0 : index
    %c0_7 = arith.constant 0 : index
    %c0_8 = arith.constant 0 : index
    %7 = vector.load %arg4[%c0_6, %c0_7, %c0_8] : memref<1x128x128xf32, #tpu.memory_space<vmem>>, vector<1x128x128xf32>
    %8 = vector.shape_cast %7 : vector<1x128x128xf32> to vector<128x128xf32>
    %9 = vector.shape_cast %6 : vector<128x128xf32> to vector<1x128x128xf32>
    tpu.vector_store %arg4[%c0_6, %c0_7, %c0_8], %9 {strides = array<i32>} : memref<1x128x128xf32, #tpu.memory_space<vmem>>, vector<1x128x128xf32>,
    return
  }
  func.func @transform_0(%arg0: i32, %arg1: i32) -> (i32, i32, i32) {
    %c0_i32 = arith.constant 0 : i32
    %c0_i32_0 = arith.constant 0 : i32
    return %arg0, %c0_i32, %arg1 : i32, i32, i32
  }
  func.func @transform_1(%arg0: i32, %arg1: i32) -> (i32, i32, i32) {
    %c0_i32 = arith.constant 0 : i32
    %c0_i32_0 = arith.constant 0 : i32
    %c0_i32_1 = arith.constant 0 : i32
    return %arg0, %c0_i32, %c0_i32_0 : i32, i32, i32
  }
  func.func @transform_2(%arg0: i32, %arg1: i32) -> (i32, i32, i32) {
    %c0_i32 = arith.constant 0 : i32
    %c0_i32_0 = arith.constant 0 : i32
    return %arg0, %arg1, %c0_i32 : i32, i32, i32
  }
}

</mosaic_0001>

<bundles_post_ra>
// kernel: tpu_custom_call.1
= control target key start
LH: loop header
LB: loop body
LE: loop exit
PB: predicated region body
PF: predicated region fallthrough
CT: control target
= control target key end

     0   :  { %7 = vsyncpa [#allocation3], 0  ;;  %s939_s0 = inlined_call_operand.vmem [shape: f32[2,5,128], index: 0, kind: input, shape index: {}]   ;;  %s940_s1 = inlined_call_operand.vmem [shape: f32[2,5,128], index: 1, kind: input, shape index: {}]   ;;  %s941_s2 = inlined_call_operand.hbm [shape: f32[2,128,128], index: 2, kind: output, shape index: {}]  }
   0x1   :  { %9 = vsyncpa [#allocation3 + $0x1], 0  ;;  %s782_s9 = smov 0   ;;  %s784_s10 = smov 0  }
   0x2   :  { %s786_s11 = smov 0   ;;  %s788_s12 = smov 0  }
   0x3   :  { %s790_s13 = smov 0   ;;  %s792_s14 = smov 0  }
   0x4 LB: > { %s550_s15 = sadd.s32 4294967295, %s762_s14   ;;  %s551_s16 = sadd.s32 4294967294, %s762_s14   ;;  %s762_s14 = sphi %s792_s14, %s15_s14   ;;  %s758_s13 = sphi %s790_s13, %s948_s13   ;;  %s754_s12 = sphi %s788_s12, %s947_s12   ;;  %s750_s11 = sphi %s786_s11, %s946_s11   ;;  %s746_s10 = sphi %s784_s10, %s945_s10   ;;  %s742_s9 = sphi %s782_s9, %s944_s9  }
   0x5   : > { %s27_s17 = sadd.s32 1, %s758_s13  ;;  %s90_s18 = sadd.s32 1, %s750_s11 }
   0x6   : > { %p29_p0 = scmp.ge.s32.totalorder %s27_s17, 2  ;;  %p100_p1 = scmp.ne.s32.totalorder %s750_s11, %s746_s10 }
   0x7   : > { %p101_p2 = scmp.eq.s32.totalorder %s550_s15, 1  ;;  %p106_p3 = scmp.ne.s32.totalorder %s746_s10, %s742_s9 }
   0x8   : > { %s950_s17 = smov (%p29_p0, %s27_s17), 0  ;;  %p107_p5 = scmp.eq.s32.totalorder %s551_s16, 1 }
   0x9   : > { %p822_p4 = por %p101_p2, %p100_p1  ;;  %s85_s20 = ssub.s32 %s758_s13, %s950_s17 }
   0xa   : > { %p554_p6 = scmp.ge.s32.totalorder %s762_s14, 1  ;;  %p88_p7 = scmp.eq.s32.totalorder %s85_s20, 0 }
   0xb   : > { %p829_p8 = por %p107_p5, %p106_p3  ;;  %p142_p9 = scmp.lt.s32.totalorder %s762_s14, 3 }
   0xc   : > { %s835_s22 = scalar_select %p88_p7, %s750_s11, %s90_s18  }
   0xd   : > { %p143_p10 = pnand %p554_p6, %p142_p9 }
   0xe   : > { %p170_p11 = scmp.lt.s32.totalorder (!%p143_p10), %s754_s12, 1  ;;  %vm265_vm0 = vcmask (!%p143_p10), 1044480   ;;  %vm216_vm1 = vcmask (!%p143_p10), 39936   ;;  %s167_s3 = sand.u32 (!%p143_p10), 1, %s746_s10  }
   0xf   : > { %146 = sbr.rel (%p143_p10) target bundleno = 446 (0x1be), region = 28  ;;  %s555_s4 = sshll.u32 (!%p143_p10), %s167_s3, 7 }
  0x10   : > { %s864_s5 = scalar_lea.vmem (!%p143_p10), [#allocation2], %s555_s4  ;;  %s580_s6 = sshll.u32 (!%p143_p10), %s754_s12, 11 }
  0x11   : > { %s462_s7 = sshll.u32 (!%p143_p10), %s864_s5, 4  ;;  %s885_s16 = scalar_lea.hbm (!%p143_p10), %s941_s2, %s580_s6  ;;  %s887_s7 = int_to_ptr.vmem [resolvable:$true] %s462_s7 }
  0x12   : > { %s893_s18 = scalar_lea.sflag (!%p143_p10), [#allocation3], %s167_s3  ;;  %s764_s20 = smov (!%p143_p10), [#allocation2]  }
  0x16   : > { %s171_s23 = scalar_select %p170_p11, %s754_s12, 1 }
  0x17   : > { %s684_s12 = scalar_lea.vmem %s887_s7, 2048 }
  0x18   : > { %s556_s24 = sshll.u32 %s171_s23, 3  ;;  %p685_p12 = scmp.ne.s32.totalorder %s887_s7, %s684_s12 }
  0x19   : > { %s176_s27 = scalar_lea.vmem %s939_s0, %s556_s24  ;;  %s180_s30 = scalar_lea.vmem %s940_s1, %s556_s24 }
  0x1a   : > { %v182_v0 = vld [vmem:[%s176_s27] sm:$0x1f]  ;;  %p686_p13 = pnand %p685_p12, %p822_p4  ;;  %s688_s23 = sshll.u32 %s764_s20, 4  ;;  %s689_s23 = int_to_ptr.vmem [resolvable:$false] %s688_s23 }
  0x1b   : > { %v183_v1 = vld [vmem:[%s180_s30] sm:$0x1f]  ;;  %184 = vxpose.xlu0.b32.start.end [1/1] (short) %v182_v0, 128  ;;  %s690_s24 = scalar_lea.vmem %s689_s23, 4096  ;;  %p691_p1 = scmp.lt.s32.totalorder %s887_s7, %s689_s23 }
  0x1c   : > { %598 = vmatprep.subr.msk.mxu0 %vm265_vm0, %v183_v1  ;;  %624 = vmatprep.subr.msk.mxu1 %vm265_vm0, %v183_v1  ;;  %p687_p0 = pneg %p686_p13  ;;  %p692_p2 = scmp.lt.s32.totalorder %s690_s24, %s684_s12 }
  0x1d   : > { %599 = vmatpush3.msk.msra.mxu0 %vm265_vm0, %v183_v1  ;;  %625 = vmatpush3.msk.msra.mxu1 %vm265_vm0, %v183_v1 }
  0x1e   : > { %p693_p3 = por %p692_p2, %p691_p1 }
  0x20   : > { %p694_p5 = pnand %p693_p3, %p687_p0 }
  0x9b   : > { %v200_v2 = vpop.trf.xlu0 }
  0x9c   : > { %600 = vmatprep.mubr.msk.f32.mxu0 %vm216_vm1, %v200_v2 }
  0x9f   : > { %v201_v3 = vpop.trf.xlu0 }
  0xa0   : > { %601 = vmatmul.mubr.msk.f32.vlgmr.msra.gmra.mrb[0].mxu0 %vm216_vm1, %v201_v3 }
  0xa3   : > { %v202_v4 = vpop.trf.xlu0 }
  0xa4   : > { %603 = vmatprep.mubr.msk.f32.mxu0 %vm216_vm1, %v202_v4 }
  0xa7   : > { %v203_v5 = vpop.trf.xlu0 }
  0xa8   : > { %604 = vmatmul.mubr.msk.f32.gmra.mrb[2].mxu0 %vm216_vm1, %v203_v5 }
  0xab   : > { %v204_v6 = vpop.trf.xlu0 }
  0xac   : > { %606 = vmatprep.mubr.msk.f32.mxu0 %vm216_vm1, %v204_v6 }
  0xaf   : > { %v205_v7 = vpop.trf.xlu0 }
  0xb0   : > { %607 = vmatmul.mubr.msk.f32.gmra.mrb[4].mxu0 %vm216_vm1, %v205_v7 }
  0xb3   : > { %v206_v8 = vpop.trf.xlu0 }
  0xb4   : > { %609 = vmatprep.mubr.msk.f32.mxu0 %vm216_vm1, %v206_v8 }
  0xb7   : > { %v207_v9 = vpop.trf.xlu0 }
  0xb8   : > { %610 = vmatmul.mubr.msk.f32.gmra.mrb[6].mxu0 %vm216_vm1, %v207_v9 }
  0xbb   : > { %v208_v10 = vpop.trf.xlu0 }
  0xbc   : > { %612 = vmatprep.mubr.msk.f32.mxu1 %vm216_vm1, %v208_v10 }
  0xbf   : > { %v209_v11 = vpop.trf.xlu0 }
  0xc0   : > { %613 = vmatmul.mubr.msk.f32.vlgmr.msra.gmra.mrb[0].mxu1 %vm216_vm1, %v209_v11 }
  0xc3   : > { %v210_v12 = vpop.trf.xlu0 }
  0xc4   : > { %615 = vmatprep.mubr.msk.f32.mxu1 %vm216_vm1, %v210_v12 }
  0xc7   : > { %v211_v13 = vpop.trf.xlu0 }
  0xc8   : > { %616 = vmatmul.mubr.msk.f32.gmra.mrb[2].mxu1 %vm216_vm1, %v211_v13 }
  0xcb   : > { %v212_v14 = vpop.trf.xlu0 }
  0xcc   : > { %618 = vmatprep.mubr.msk.f32.mxu1 %vm216_vm1, %v212_v14 }
  0xcf   : > { %v213_v15 = vpop.trf.xlu0 }
  0xd0   : > { %619 = vmatmul.mubr.msk.f32.gmra.mrb[4].mxu1 %vm216_vm1, %v213_v15 }
  0xd3   : > { %v214_v16 = vpop.trf.xlu0 }
  0xd4   : > { %621 = vmatprep.mubr.msk.f32.mxu1 %vm216_vm1, %v214_v16 }
  0xd7   : > { %v215_v17 = vpop.trf.xlu0 }
  0xd8   : > { %622 = vmatmul.mubr.msk.f32.gmra.mrb[6].mxu1 %vm216_vm1, %v215_v17 }
 0x173   : > { %v602_v18 = vpop.f32.mrb[0].mxu0 }
 0x174   : > { %v415_v19 = vmax.f32 %v602_v18, 1e-12  ;;  %v335_v20 = vpop.f32.mrb[1].mxu0 }
 0x175   : > { %v414_v21 = vmax.f32 %v335_v20, 1e-12 }
 0x176   : > { %431 = vst [vmem:[%s864_s5 + $0x8] sm:$0xff] %v415_v19 }
 0x177   : > { %430 = vst [vmem:[%s864_s5] sm:$0xff] %v414_v21 }
 0x17b   : > { %v605_v22 = vpop.f32.mrb[2].mxu0 }
 0x17c   : > { %v417_v23 = vmax.f32 %v605_v22, 1e-12  ;;  %v345_v24 = vpop.f32.mrb[3].mxu0 }
 0x17d   : > { %v416_v25 = vmax.f32 %v345_v24, 1e-12 }
 0x17e   : > { %433 = vst [vmem:[%s864_s5 + $0x18] sm:$0xff] %v417_v23 }
 0x17f   : > { %432 = vst [vmem:[%s864_s5 + $0x10] sm:$0xff] %v416_v25 }
 0x183   : > { %v608_v26 = vpop.f32.mrb[4].mxu0 }
 0x184   : > { %v419_v27 = vmax.f32 %v608_v26, 1e-12  ;;  %v355_v28 = vpop.f32.mrb[5].mxu0 }
 0x185   : > { %v418_v29 = vmax.f32 %v355_v28, 1e-12 }
 0x186   : > { %435 = vst [vmem:[%s864_s5 + $0x28] sm:$0xff] %v419_v27 }
 0x187   : > { %434 = vst [vmem:[%s864_s5 + $0x20] sm:$0xff] %v418_v29 }
 0x18b   : > { %v611_v30 = vpop.f32.mrb[6].mxu0 }
 0x18c   : > { %v421_v31 = vmax.f32 %v611_v30, 1e-12  ;;  %v365_v32 = vpop.f32.mrb[7].mxu0 }
 0x18d   : > { %v420_v33 = vmax.f32 %v365_v32, 1e-12 }
 0x18e   : > { %437 = vst [vmem:[%s864_s5 + $0x38] sm:$0xff] %v421_v31 }
 0x18f   : > { %436 = vst [vmem:[%s864_s5 + $0x30] sm:$0xff] %v420_v33 }
 0x193   : > { %v614_v34 = vpop.f32.mrb[0].mxu1 }
 0x194   : > { %v423_v35 = vmax.f32 %v614_v34, 1e-12  ;;  %v375_v36 = vpop.f32.mrb[1].mxu1 }
 0x195   : > { %v422_v37 = vmax.f32 %v375_v36, 1e-12 }
 0x196   : > { %439 = vst [vmem:[%s864_s5 + $0x48] sm:$0xff] %v423_v35 }
 0x197   : > { %438 = vst [vmem:[%s864_s5 + $0x40] sm:$0xff] %v422_v37 }
 0x19b   : > { %v617_v38 = vpop.f32.mrb[2].mxu1 }
 0x19c   : > { %v425_v39 = vmax.f32 %v617_v38, 1e-12  ;;  %v385_v40 = vpop.f32.mrb[3].mxu1 }
 0x19d   : > { %v424_v41 = vmax.f32 %v385_v40, 1e-12 }
 0x19e   : > { %441 = vst [vmem:[%s864_s5 + $0x58] sm:$0xff] %v425_v39 }
 0x19f   : > { %440 = vst [vmem:[%s864_s5 + $0x50] sm:$0xff] %v424_v41 }
 0x1a3   : > { %v620_v42 = vpop.f32.mrb[4].mxu1 }
 0x1a4   : > { %v427_v43 = vmax.f32 %v620_v42, 1e-12  ;;  %v395_v44 = vpop.f32.mrb[5].mxu1 }
 0x1a5   : > { %v426_v45 = vmax.f32 %v395_v44, 1e-12 }
 0x1a6   : > { %443 = vst [vmem:[%s864_s5 + $0x68] sm:$0xff] %v427_v43 }
 0x1a7   : > { %442 = vst [vmem:[%s864_s5 + $0x60] sm:$0xff] %v426_v45 }
 0x1ab   : > { %v623_v46 = vpop.f32.mrb[6].mxu1 }
 0x1ac   : > { %v429_v47 = vmax.f32 %v623_v46, 1e-12  ;;  %v405_v48 = vpop.f32.mrb[7].mxu1 }
 0x1ad   : > { %v428_v49 = vmax.f32 %v405_v48, 1e-12 }
 0x1ae   : > { %445 = vst [vmem:[%s864_s5 + $0x78] sm:$0xff] %v429_v47 }
 0x1af   : > { %444 = vst [vmem:[%s864_s5 + $0x70] sm:$0xff] %v428_v49 }
 0x1b0   : > { %697 = shalt.err (!%p694_p5)
}
 0x1b1   : > { %s698_s25 = scalar_lea.hbm %s885_s16, 2048  ;;  %s702_s28 = scalar_lea.hbm %s941_s2, 4096 }
 0x1b2   : > { %p699_p6 = scmp.ne.s32.totalorder %s885_s16, %s698_s25  ;;  %p703_p10 = scmp.lt.u32.totalorder %s885_s16, %s941_s2 }
 0x1b3   : > { %p704_p11 = scmp.lt.u32.totalorder %s702_s28, %s698_s25  ;;  %p706_p13 = scmp.lt.u32.totalorder %s698_s25, %s885_s16 }
 0x1b4   : > { %p700_p7 = pnand %p699_p6, %p822_p4 }
 0x1b5   : > { %p705_p12 = por %p704_p11, %p703_p10 }
 0x1b6   : > { %p701_p9 = pneg %p700_p7 }
 0x1b7   : > { %p707_p0 = por %p706_p13, %p705_p12 }
 0x1b9   : > { %p708_p1 = pnand %p707_p0, %p701_p9 }
 0x1bb   : > { %711 = shalt.err (!%p708_p1)
}
 0x1bc   : > { %s765_s3 = smov 128   ;;  %s766_s4 = smov 8  }
 0x1bd   : > { %626 = dma.vmem_to_hbm [thread:$0]  (%p822_p4), %s887_s7, 2048, %s885_s16, %s893_s18, %s765_s3, %s765_s3, %s766_s4  }
 0x1be PF: > { %p632_p2 = scmp.ge.s32.totalorder %s762_s14, 2  ;;  %s477_s5 = sand.u32 1, %s742_s9  }
 0x1bf   : > { %s478_s6 = scalar_lea.sflag [#allocation3], %s477_s5 }
 0x1c0   : > { %p629_p3 = pnand %p632_p2, %p829_p8 }
 0x1c2   : > { %737 = dma.done.wait (!%p629_p3), %s478_s6, 2048  }
 0x1c3   : > { %739 = vsyncadd (!%p629_p3), %s478_s6, 4294965248  ;;  %s15_s14 = sadd.s32 1, %s762_s14   ;;  %s944_s9 = smov %s746_s10 }
 0x1c4   : > { %p12_p5 = scmp.ge.s32.totalorder %s15_s14, 4   ;;  %s945_s10 = smov %s750_s11 }
 0x1c5   : > { %s946_s11 = smov %s835_s22  ;;  %s947_s12 = smov %s758_s13 }
 0x1c6   : > { %s948_s13 = smov %s950_s17  ;;  %14 = sbr.rel (!%p12_p5) target bundleno = 4 (0x4), region = 66 }
 0x1cd   :  { %483 = vsyncpa [#allocation3], 1 }
 0x1ce   :  { %485 = vsyncpa [#allocation3 + $0x1], 1 }

</bundles_post_ra>
